<compile_context>
chip_gen: v7x
topology: tpu7x:2x2x1
jax: 0.10.0
libtpu: 0.0.40
codegen_flags: <defaults>
</compile_context>

<pallas_src>
import jax
import jax.numpy as jnp
from jax.experimental import pallas as pl
from jax.experimental.pallas import tpu as pltpu


# ----------------------------- Pallas kernel ------------------------------ #
def shared_encoder_kernel(x_ref, w1_ref, b1_ref, w2_ref, b2_ref, out_ref):
    """out = relu(x @ w1 + b1) @ w2 + b2 for one row-tile of stacked modes."""
    # Layer 1: (tm, D) @ (D, H) on the MXU — bf16 inputs, f32 accumulation.
    h = jnp.dot(x_ref[...], w1_ref[...], preferred_element_type=jnp.float32)
    h = jnp.maximum(h + b1_ref[...], 0.0)          # bias + ReLU in f32 (VPU)
    # Layer 2: (tm, H) @ (H, E_pad) — E padded to 128 lanes => unmasked stores.
    out = jnp.dot(h.astype(jnp.bfloat16), w2_ref[...],
                  preferred_element_type=jnp.float32)
    out_ref[...] = out + b2_ref[...]


def _fused_shared_encoder(x_bf16, w1_bf16, b1_f32, w2_bf16, b2_f32, tm):
    """One pallas_call over the (row-tiled) stacked rows of all modes."""
    R, D = x_bf16.shape
    H = w1_bf16.shape[1]
    E_pad = w2_bf16.shape[1]
    assert R % tm == 0
    grid = (R // tm,)

    b1_2d = b1_f32.reshape(1, -1)
    b2_2d = b2_f32.reshape(1, -1)

    cost = pl.CostEstimate(
        flops=2 * R * D * H + 2 * R * H * E_pad,
        transcendentals=0,
        bytes_accessed=(x_bf16.size * 2 + w1_bf16.size * 2 + w2_bf16.size * 2
                        + b1_2d.size * 4 + b2_2d.size * 4 + R * E_pad * 4),
    )

    return pl.pallas_call(
        shared_encoder_kernel,
        out_shape=jax.ShapeDtypeStruct((R, E_pad), jnp.float32),
        grid=grid,
        in_specs=[
            pl.BlockSpec((tm, D), lambda i: (i, 0)),       # row tile of inputs
            pl.BlockSpec((D, H), lambda i: (0, 0)),        # shared w1 (resident)
            pl.BlockSpec((1, H), lambda i: (0, 0)),        # shared b1
            pl.BlockSpec((H, E_pad), lambda i: (0, 0)),    # shared w2 (resident)
            pl.BlockSpec((1, E_pad), lambda i: (0, 0)),    # shared b2
        ],
        out_specs=pl.BlockSpec((tm, E_pad), lambda i: (i, 0)),
        compiler_params=pltpu.CompilerParams(
            dimension_semantics=("parallel",)),
        cost_estimate=cost,
    )(x_bf16, w1_bf16, b1_2d, w2_bf16, b2_2d)


# ------------------------------ host wrapper ------------------------------ #
def _pad_axis(a, axis, multiple):
    pad = (-a.shape[axis]) % multiple
    if pad == 0:
        return a
    widths = [(0, 0)] * a.ndim
    widths[axis] = (0, pad)
    return jnp.pad(a, widths)


def multimodal_encoder_shared(mode_inputs, params):
    """
    mode_inputs : list of mode tensors; each is flattened to (B_i, D) and must
                  be compatible with the shared embedding network (same D).
    params      : (w1, b1, w2, b2) of the SHARED embedding network.
    Returns the list of embeddings [ (B_i, E) for each mode ], matching the
    PyTorch forward `[self.embedding_network(i) for i in mode_inputs]`.
    """
    w1, b1, w2, b2 = params
    E = w2.shape[1]

    # Glue: flatten any >2-D mode input (e.g. NCHW image) to (B, D).
    flat = [x.reshape(x.shape[0], -1) for x in mode_inputs]
    batch_sizes = [x.shape[0] for x in flat]

    # Stack all modes: one big matmul through the shared network.
    x_all = jnp.concatenate(flat, axis=0)                    # (sum(B_i), D)
    rows = x_all.shape[0]

    # Row tiling: single tile at small shapes; 256-row tiles for big batches
    # (row axis is "parallel" => megacore/v7x shards tiles across TCs).
    rows_8 = rows + ((-rows) % 8)
    if rows_8 <= 256:
        tm = rows_8
    else:
        tm = 256
    x_pad = _pad_axis(x_all, 0, tm).astype(jnp.bfloat16)

    # Pad E to 128 lanes (zero columns) => unmasked lane-dense stores.
    w2_pad = _pad_axis(w2, 1, 128).astype(jnp.bfloat16)
    b2_pad = _pad_axis(b2, 0, 128)

    out_pad = _fused_shared_encoder(
        x_pad, w1.astype(jnp.bfloat16), b1, w2_pad, b2_pad, tm)

    out = out_pad[:rows, :E]                                 # strip padding

    # Split back into the per-mode list (same order as the inputs).
    results, off = [], 0
    for bsz in batch_sizes:
        results.append(out[off:off + bsz])
        off += bsz
    return results


# ------------------------- parameter construction ------------------------- #
def make_linear_params(key, in_dim, out_dim):
    """Deterministic init mimicking nn.Linear defaults (uniform +-1/sqrt(in))."""
    k_w, k_b = jax.random.split(key)
    bound = 1.0 / jnp.sqrt(jnp.float32(in_dim))
    w = jax.random.uniform(k_w, (in_dim, out_dim), jnp.float32, -bound, bound)
    b = jax.random.uniform(k_b, (out_dim,), jnp.float32, -bound, bound)
    return w, b


# --------------------------------- main ----------------------------------- #
if __name__ == "__main__":
    key = jax.random.PRNGKey(0)
    k_img, k_vec, k_w1, k_w2 = jax.random.split(key, 4)

    B = 2                       # batch per mode
    C, Hh, Ww = 4, 8, 8         # mode-0 image (NCHW)
    D = C * Hh * Ww             # 256 — every mode must match the shared net
    HID = 128                   # hidden dim of the shared embedding network
    E = 32                      # embedding dim (padded to 128 inside)

    # Mode inputs (same shared network => same flattened feature dim D).
    x_img = jax.random.normal(k_img, (B, C, Hh, Ww), jnp.float32)   # image mode
    x_vec = jax.random.normal(k_vec, (B, D), jnp.float32)           # vector mode

    # Shared embedding network parameters (one set, used for ALL modes).
    w1, b1 = make_linear_params(k_w1, D, HID)
    w2, b2 = make_linear_params(k_w2, HID, E)
    params = (w1, b1, w2, b2)

    out = multimodal_encoder_shared([x_img, x_vec], params)
    out = jax.block_until_ready(out)

    # Reference (pure f32 JAX) — same shared network applied to each input.
    def ref_net(x):
        xf = x.reshape(x.shape[0], -1)
        h = jnp.maximum(xf @ w1 + b1, 0.0)
        return h @ w2 + b2

    refs = [ref_net(x_img), ref_net(x_vec)]
    assert len(out) == len(refs)
    for o, r in zip(out, refs):
        assert o.shape == (B, E)
        # bf16 MXU inputs with f32 accumulation -> loosen tolerance vs pure f32.
        assert jnp.allclose(o, r, atol=5e-2, rtol=5e-2), float(jnp.max(jnp.abs(o - r)))

    print("KERNEL_OK")
</pallas_src>

<mosaic_0001>
module attributes {stable_mosaic.version = 11 : i64} {
  func.func @shared_encoder_kernel(%arg0: i32, %arg1: memref<8x256xbf16, #tpu.memory_space<vmem>>, %arg2: memref<256x128xbf16, #tpu.memory_space<vmem>>, %arg3: memref<1x128xf32, #tpu.memory_space<vmem>>, %arg4: memref<128x128xbf16, #tpu.memory_space<vmem>>, %arg5: memref<1x128xf32, #tpu.memory_space<vmem>>, %arg6: memref<8x128xf32, #tpu.memory_space<vmem>>) attributes {dimension_semantics = [#tpu.dimension_semantics<parallel>], iteration_bounds = array<i64: 1>, scalar_prefetch = 0 : i64, scratch_operands = 0 : i64, tpu.core_type = #tpu.core_type<tc>, window_params = [{transform_indices = @transform_0, window_bounds = array<i64: 8, 256>}, {pipeline_mode = #tpu.pipeline_mode<synchronous>, transform_indices = @transform_1, window_bounds = array<i64: 256, 128>}, {pipeline_mode = #tpu.pipeline_mode<synchronous>, transform_indices = @transform_2, window_bounds = array<i64: 1, 128>}, {pipeline_mode = #tpu.pipeline_mode<synchronous>, transform_indices = @transform_3, window_bounds = array<i64: 128, 128>}, {pipeline_mode = #tpu.pipeline_mode<synchronous>, transform_indices = @transform_4, window_bounds = array<i64: 1, 128>}, {transform_indices = @transform_5, window_bounds = array<i64: 8, 128>}]} {
    %c0 = arith.constant 0 : index
    %c0_0 = arith.constant 0 : index
    %0 = vector.load %arg1[%c0, %c0_0] : memref<8x256xbf16, #tpu.memory_space<vmem>>, vector<8x256xbf16>
    %c0_1 = arith.constant 0 : index
    %c0_2 = arith.constant 0 : index
    %1 = vector.load %arg2[%c0_1, %c0_2] : memref<256x128xbf16, #tpu.memory_space<vmem>>, vector<256x128xbf16>
    %cst = arith.constant dense<0.000000e+00> : vector<8x128xf32>
    %2 = tpu.matmul %0, %1, %cst {dimension_numbers = #tpu.dot_dimension_numbers<[1], [0], [0], [1], [0, 0, 1, 1], [], []>} : vector<8x256xbf16>, vector<256x128xbf16>, vector<8x128xf32> -> vector<8x128xf32>
    %c0_3 = arith.constant 0 : index
    %c0_4 = arith.constant 0 : index
    %3 = vector.load %arg3[%c0_3, %c0_4] : memref<1x128xf32, #tpu.memory_space<vmem>>, vector<1x128xf32>
    %4 = vector.broadcast %3 : vector<1x128xf32> to vector<8x128xf32>
    %5 = arith.addf %2, %4 : vector<8x128xf32>
    %cst_5 = arith.constant 0.000000e+00 : f32
    %6 = vector.broadcast %cst_5 : f32 to vector<8x128xf32>
    %7 = arith.maximumf %5, %6 : vector<8x128xf32>
    %8 = arith.truncf %7 : vector<8x128xf32> to vector<8x128xbf16>
    %c0_6 = arith.constant 0 : index
    %c0_7 = arith.constant 0 : index
    %9 = vector.load %arg4[%c0_6, %c0_7] : memref<128x128xbf16, #tpu.memory_space<vmem>>, vector<128x128xbf16>
    %cst_8 = arith.constant dense<0.000000e+00> : vector<8x128xf32>
    %10 = tpu.matmul %8, %9, %cst_8 {dimension_numbers = #tpu.dot_dimension_numbers<[1], [0], [0], [1], [0, 0, 1, 1], [], []>} : vector<8x128xbf16>, vector<128x128xbf16>, vector<8x128xf32> -> vector<8x128xf32>
    %c0_9 = arith.constant 0 : index
    %c0_10 = arith.constant 0 : index
    %11 = vector.load %arg5[%c0_9, %c0_10] : memref<1x128xf32, #tpu.memory_space<vmem>>, vector<1x128xf32>
    %12 = vector.broadcast %11 : vector<1x128xf32> to vector<8x128xf32>
    %13 = arith.addf %10, %12 : vector<8x128xf32>
    %c0_11 = arith.constant 0 : index
    %c0_12 = arith.constant 0 : index
    %14 = vector.load %arg6[%c0_11, %c0_12] : memref<8x128xf32, #tpu.memory_space<vmem>>, vector<8x128xf32>
    tpu.vector_store %arg6[%c0_11, %c0_12], %13 {strides = array<i32>} : memref<8x128xf32, #tpu.memory_space<vmem>>, vector<8x128xf32>,
    return
  }
  func.func @transform_0(%arg0: i32) -> (i32, i32) {
    %c0_i32 = arith.constant 0 : i32
    %c0_i32_0 = arith.constant 0 : i32
    return %arg0, %c0_i32 : i32, i32
  }
  func.func @transform_1(%arg0: i32) -> (i32, i32) {
    %c0_i32 = arith.constant 0 : i32
    %c0_i32_0 = arith.constant 0 : i32
    %c0_i32_1 = arith.constant 0 : i32
    return %c0_i32, %c0_i32_0 : i32, i32
  }
  func.func @transform_2(%arg0: i32) -> (i32, i32) {
    %c0_i32 = arith.constant 0 : i32
    %c0_i32_0 = arith.constant 0 : i32
    %c0_i32_1 = arith.constant 0 : i32
    return %c0_i32, %c0_i32_0 : i32, i32
  }
  func.func @transform_3(%arg0: i32) -> (i32, i32) {
    %c0_i32 = arith.constant 0 : i32
    %c0_i32_0 = arith.constant 0 : i32
    %c0_i32_1 = arith.constant 0 : i32
    return %c0_i32, %c0_i32_0 : i32, i32
  }
  func.func @transform_4(%arg0: i32) -> (i32, i32) {
    %c0_i32 = arith.constant 0 : i32
    %c0_i32_0 = arith.constant 0 : i32
    %c0_i32_1 = arith.constant 0 : i32
    return %c0_i32, %c0_i32_0 : i32, i32
  }
  func.func @transform_5(%arg0: i32) -> (i32, i32) {
    %c0_i32 = arith.constant 0 : i32
    %c0_i32_0 = arith.constant 0 : i32
    return %arg0, %c0_i32 : i32, i32
  }
}

</mosaic_0001>

<bundles_post_ra>
// kernel: tpu_custom_call.1
= control target key start
LH: loop header
LB: loop body
LE: loop exit
PB: predicated region body
PF: predicated region fallthrough
CT: control target
= control target key end

     0   :  { %10 = vsyncpa [#allocation3], 0  ;;  %s688_s0 = inlined_call_operand.hbm [shape: bf16[8,256], index: 0, kind: input, shape index: {}]   ;;  %s689_s1 = inlined_call_operand.hbm [shape: bf16[256,128], index: 1, kind: input, shape index: {}]   ;;  %s690_s2 = inlined_call_operand.vmem [shape: f32[1,128], index: 2, kind: input, shape index: {}]   ;;  %s691_s3 = inlined_call_operand.hbm [shape: bf16[128,128], index: 3, kind: input, shape index: {}]   ;;  %s692_s4 = inlined_call_operand.vmem [shape: f32[1,128], index: 4, kind: input, shape index: {}]   ;;  %s693_s5 = inlined_call_operand.hbm [shape: f32[8,128], index: 5, kind: output, shape index: {}]  }
   0x1   :  { %11 = vsyncpa [#allocation6], 0 }
   0x2   :  { %12 = vsyncpa [#allocation4], 0  ;;  %s581_s18 = smov [#allocation5]   ;;  %s487_s22 = scalar_lea.hbm %s689_s1, 2048 }
   0x3   :  { %s28_s19 = sshll.u32 %s581_s18, 4  ;;  %p488_p0 = scmp.ne.s32.totalorder %s689_s1, %s487_s22  ;;  %s29_s19 = int_to_ptr.vmem [resolvable:$true] %s28_s19 }
   0x4   :  { %p491_p1 = scmp.lt.u32.totalorder %s487_s22, %s689_s1 }
   0x6   :  { %p493_p2 = pnand %p491_p1, %p488_p0 }
   0x8   :  { %496 = shalt.err (!%p493_p2)
}
   0x9   :  { %s497_s27 = scalar_lea.vmem %s29_s19, 2048  ;;  %p502_p4 = scmp.lt.s32.totalorder %s29_s19, %s29_s19 }
   0xa   :  { %p498_p3 = scmp.ne.s32.totalorder %s29_s19, %s497_s27  ;;  %p503_p5 = scmp.lt.s32.totalorder %s497_s27, %s497_s27 }
   0xc   :  { %p504_p6 = por %p503_p5, %p502_p4 }
   0xe   :  { %p505_p7 = pnand %p504_p6, %p498_p3 }
  0x10   :  { %508 = shalt.err (!%p505_p7)
}
  0x11   :  { %s582_s28 = smov 64   ;;  %s583_s29 = smov 4  }
  0x12   :  { %34 = dma.hbm_to_vmem [thread:$0]  %s689_s1, 2048, %s29_s19, [#allocation6], %s582_s28, %s582_s28, %s583_s29  }
  0x13   :  { %s584_s7 = smov [#allocation2]   ;;  %s585_s9 = smov [#allocation7]  }
  0x14   :  { %s19_s8 = sshll.u32 %s584_s7, 4  ;;  %s42_s10 = sshll.u32 %s585_s9, 4  ;;  %s20_s8 = int_to_ptr.vmem [resolvable:$true] %s19_s8  ;;  %s43_s10 = int_to_ptr.vmem [resolvable:$true] %s42_s10 }
  0x15   :  { %s509_s13 = scalar_lea.hbm %s688_s0, 128 }
  0x16   :  { %p510_p8 = scmp.ne.s32.totalorder %s688_s0, %s509_s13  ;;  %p513_p9 = scmp.lt.u32.totalorder %s509_s13, %s688_s0 }
  0x18   :  { %p515_p10 = pnand %p513_p9, %p510_p8 }
  0x1a   :  { %518 = shalt.err (!%p515_p10)
}
  0x1b   :  { %s519_s1 = scalar_lea.vmem %s20_s8, 128  ;;  %p524_p12 = scmp.lt.s32.totalorder %s20_s8, %s20_s8 }
  0x1c   :  { %p520_p11 = scmp.ne.s32.totalorder %s20_s8, %s519_s1  ;;  %p525_p13 = scmp.lt.s32.totalorder %s519_s1, %s519_s1 }
  0x1e   :  { %p526_p0 = por %p525_p13, %p524_p12 }
  0x20   :  { %p527_p1 = pnand %p526_p0, %p520_p11 }
  0x22   :  { %530 = shalt.err (!%p527_p1)
}
  0x23   :  { %22 = dma.hbm_to_vmem [thread:$0]  %s688_s0, 128, %s20_s8, [#allocation3]  }
  0x24   :  { %s531_s22 = scalar_lea.hbm %s691_s3, 1024 }
  0x25   :  { %p532_p2 = scmp.ne.s32.totalorder %s691_s3, %s531_s22  ;;  %p535_p3 = scmp.lt.u32.totalorder %s531_s22, %s691_s3 }
  0x27   :  { %p537_p4 = pnand %p535_p3, %p532_p2 }
  0x29   :  { %540 = shalt.err (!%p537_p4)
}
  0x2a   :  { %s541_s27 = scalar_lea.vmem %s43_s10, 1024  ;;  %p546_p6 = scmp.lt.s32.totalorder %s43_s10, %s43_s10 }
  0x2b   :  { %p542_p5 = scmp.ne.s32.totalorder %s43_s10, %s541_s27  ;;  %p547_p7 = scmp.lt.s32.totalorder %s541_s27, %s541_s27 }
  0x2d   :  { %p548_p8 = por %p547_p7, %p546_p6 }
  0x2f   :  { %p549_p9 = pnand %p548_p8, %p542_p5 }
  0x31   :  { %552 = shalt.err (!%p549_p9)
}
  0x32   :  { %48 = dma.hbm_to_vmem [thread:$0]  %s691_s3, 1024, %s43_s10, [#allocation6], %s582_s28, %s582_s28, %s583_s29  }
  0x33   :  { %575 = dma.done.wait [#allocation3], 128  }
  0x34   :  { %576 = vsyncadd [#allocation3], 4294967168 }
  0x35   :  { %577 = dma.done.wait [#allocation6], 3072  }
  0x36   :  { %578 = vsyncadd [#allocation6], 4294964224  ;;  %v586_v0 = vmov 0.0   ;;  %v461_v1 = vld [vmem:[#allocation5 + $0x40] sm:$0xff]   ;;  %v463_v3 = vld [vmem:[#allocation5 + $0x48] sm:$0xff]   ;;  %vm587_vm0 = vmmov 0  }
  0x37   :  { %433 = vmatprep.subr.bf16.mxu1 %v586_v0  ;;  %v462_v2 = vld [vmem:[#allocation5] sm:$0xff]   ;;  %402 = vmatprep.subr.bf16.mxu0 %v461_v1  ;;  %v464_v4 = vld [vmem:[#allocation5 + $0x8] sm:$0xff]   ;;  %v465_v5 = vld [vmem:[#allocation5 + $0x50] sm:$0xff]   ;;  %s588_s7 = smov [#allocation8]  }
  0x38   :  { %403 = vmatpush3.bf16.msra.mxu0 %v462_v2  ;;  %v466_v6 = vld [vmem:[#allocation5 + $0x10] sm:$0xff]   ;;  %v467_v7 = vld [vmem:[#allocation5 + $0x58] sm:$0xff]   ;;  %v469_v9 = vld [vmem:[#allocation5 + $0x60] sm:$0xff]   ;;  %449 = vmatprep.mubr.msk.bf16.mxu1 %vm587_vm0, %v586_v0  ;;  %s364_s8 = sshll.u32 %s588_s7, 4  ;;  %s365_s8 = int_to_ptr.vmem [resolvable:$true] %s364_s8 }
  0x39   :  { %404 = vmatprep.subr.bf16.mxu0 %v463_v3  ;;  %v468_v8 = vld [vmem:[#allocation5 + $0x18] sm:$0xff]   ;;  %v470_v10 = vld [vmem:[#allocation5 + $0x20] sm:$0xff]   ;;  %v471_v11 = vld [vmem:[#allocation5 + $0x68] sm:$0xff]   ;;  %p558_p11 = scmp.lt.s32.totalorder %s365_s8, %s365_s8 }
  0x3a   :  { %v61_v12 = vld [vmem:[#allocation2] sm:$0xff]  ;;  %v479_v14 = vld [vmem:[#allocation7] sm:$0xff]   ;;  %v472_v15 = vld [vmem:[#allocation5 + $0x28] sm:$0xff]  }
  0x3b   :  { %v376_v13 = vcombine.high %v61_v12, %v61_v12  ;;  %v473_v16 = vld [vmem:[#allocation5 + $0x70] sm:$0xff]   ;;  %434 = vmatpush3.bf16.msra.mxu1 %v479_v14  ;;  %v480_v17 = vld [vmem:[#allocation7 + $0x8] sm:$0xff]   ;;  %v475_v19 = vld [vmem:[#allocation5 + $0x78] sm:$0xff]   ;;  %v375_v23 = vcombine.low %v61_v12, %v61_v12 }
  0x3c   :  { %405 = vmatpush3.bf16.msra.mxu0 %v464_v4  ;;  %435 = vmatprep.subr.bf16.mxu1 %v586_v0  ;;  %v474_v18 = vld [vmem:[#allocation5 + $0x30] sm:$0xff]   ;;  %v476_v21 = vld [vmem:[#allocation5 + $0x38] sm:$0xff]   ;;  %v483_v24 = vld [vmem:[#allocation7 + $0x20] sm:$0xff]  }
  0x3d   :  { %406 = vmatprep.subr.bf16.mxu0 %v465_v5  ;;  %236 = vmatprep.mubr.bf16.mxu0 %v376_v13  ;;  %v481_v20 = vld [vmem:[#allocation7 + $0x10] sm:$0xff]   ;;  %v482_v22 = vld [vmem:[#allocation7 + $0x18] sm:$0xff]   ;;  %v484_v25 = vld [vmem:[#allocation7 + $0x28] sm:$0xff]  }
  0x3e   :  { %v485_v26 = vld [vmem:[#allocation7 + $0x30] sm:$0xff]   ;;  %v486_v27 = vld [vmem:[#allocation7 + $0x38] sm:$0xff]  }
  0x3f   :  { %436 = vmatpush3.bf16.msra.mxu1 %v480_v17  ;;  %v374_v29 = vld [vmem:[%s690_s2] ss:$0 sm:$0xff]  ;;  %s553_s2 = scalar_lea.vmem %s365_s8, 128 }
  0x40   :  { %407 = vmatpush3.bf16.msra.mxu0 %v466_v6  ;;  %437 = vmatprep.subr.bf16.mxu1 %v586_v0  ;;  %v393_v37 = vld [vmem:[%s692_s4] ss:$0 sm:$0xff]  ;;  %p554_p10 = scmp.ne.s32.totalorder %s365_s8, %s553_s2  ;;  %p559_p12 = scmp.lt.s32.totalorder %s553_s2, %s553_s2 }
  0x41   :  { %408 = vmatprep.subr.bf16.mxu0 %v467_v7 }
  0x42   :  { %p560_p13 = por %p559_p12, %p558_p11 }
  0x43   :  { %438 = vmatpush3.bf16.msra.mxu1 %v481_v20 }
  0x44   :  { %409 = vmatpush3.bf16.msra.mxu0 %v468_v8  ;;  %439 = vmatprep.subr.bf16.mxu1 %v586_v0  ;;  %p561_p0 = pnand %p560_p13, %p554_p10 }
  0x45   :  { %410 = vmatprep.subr.bf16.mxu0 %v469_v9 }
  0x47   :  { %440 = vmatpush3.bf16.msra.mxu1 %v482_v22 }
  0x48   :  { %411 = vmatpush3.bf16.msra.mxu0 %v470_v10  ;;  %441 = vmatprep.subr.bf16.mxu1 %v586_v0 }
  0x49   :  { %412 = vmatprep.subr.bf16.mxu0 %v471_v11 }
  0x4b   :  { %442 = vmatpush3.bf16.msra.mxu1 %v483_v24 }
  0x4c   :  { %413 = vmatpush3.bf16.msra.mxu0 %v472_v15  ;;  %443 = vmatprep.subr.bf16.mxu1 %v586_v0 }
  0x4d   :  { %414 = vmatprep.subr.bf16.mxu0 %v473_v16 }
  0x4f   :  { %444 = vmatpush3.bf16.msra.mxu1 %v484_v25 }
  0x50   :  { %415 = vmatpush3.bf16.msra.mxu0 %v474_v18  ;;  %445 = vmatprep.subr.bf16.mxu1 %v586_v0 }
  0x51   :  { %416 = vmatprep.subr.bf16.mxu0 %v475_v19 }
  0x53   :  { %446 = vmatpush3.bf16.msra.mxu1 %v485_v26 }
  0x54   :  { %417 = vmatpush3.bf16.msra.mxu0 %v476_v21  ;;  %447 = vmatprep.subr.bf16.mxu1 %v586_v0 }
  0x57   :  { %237 = vmatmul.mubr.bf16.vlgmr.msra.gmra.mrb[0].mxu0 %v375_v23  ;;  %448 = vmatpush3.bf16.msra.mxu1 %v486_v27 }
 0x12a   :  { %v418_v28 = vpop.f32.mrb[0].mxu0 }
 0x12b   :  { %v419_v30 = vpop.f32.mrb[1].mxu0 }
 0x12c   :  { %v420_v31 = vadd.f32 %v419_v30, %v418_v28  ;;  %v421_v32 = vpop.f32.mrb[2].mxu0 }
 0x12d   :  { %v422_v33 = vpop.f32.mrb[3].mxu0 }
 0x12e   :  { %v239_v34 = vadd.f32 %v420_v31, %v374_v29 }
 0x130   :  { %v244_v35 = vmax.f32 %v239_v34, 0.0 }
 0x132   :  { %v245_v36 = vpack.c.bf16 %v244_v35, %v244_v35 }
 0x134   :  { %450 = vmatmul.mubr.bf16.vlgmr.msra.gmra.mrb[0].mxu1 %v245_v36 }
 0x207   :  { %v351_v38 = vpop.f32.mrb[0].mxu1 }
 0x208   :  { %v352_v39 = vadd.f32 %v393_v37, %v351_v38  ;;  %v451_v40 = vpop.f32.mrb[1].mxu1 }
 0x209   :  { %v354_v41 = vpop.f32.mrb[2].mxu1 }
 0x20a   :  { %357 = vst [vmem:[#allocation8] sm:$0xff] %v352_v39  ;;  %v452_v42 = vpop.f32.mrb[3].mxu1 }
 0x20b   :  { %564 = shalt.err (!%p561_p0)
}
 0x20c   :  { %s565_s4 = scalar_lea.hbm %s693_s5, 128 }
 0x20d   :  { %p566_p1 = scmp.ne.s32.totalorder %s693_s5, %s565_s4  ;;  %p569_p2 = scmp.lt.u32.totalorder %s565_s4, %s693_s5 }
 0x20f   :  { %p571_p3 = pnand %p569_p2, %p566_p1 }
 0x211   :  { %574 = shalt.err (!%p571_p3)
}
 0x212   :  { %367 = dma.vmem_to_hbm [thread:$0]  %s365_s8, 128, %s693_s5, [#allocation4]  }
 0x213   :  { %579 = dma.done.wait [#allocation4], 128  }
 0x214   :  { %580 = vsyncadd [#allocation4], 4294967168 }
 0x215   :  { %371 = vsyncpa [#allocation3], 1 }
 0x216   :  { %372 = vsyncpa [#allocation6], 1 }
 0x217   :  { %373 = vsyncpa [#allocation4], 1 }

</bundles_post_ra>
